<compile_context>
chip_gen: v7x
topology: tpu7x:2x2x1
jax: 0.10.0
libtpu: 0.0.40
codegen_flags: <defaults>
</compile_context>

<pallas_src>
import functools

import jax
import jax.numpy as jnp
from jax import lax
from jax.experimental import pallas as pl
from jax.experimental.pallas import tpu as pltpu

# scaled-down module constants (real model: NUM_THETAS = 64, hidden = 256)
NUM_THETAS = 8            # num_thetas == bump_steps
FEATURE_DIM = 16
HIDDEN_DIM = 32
NUM_CLASSES = 5
ECT_SCALE = 100.0         # sigmoid sharpness of the dect EctLayer ('points')
LN_EPS = 1e-5

D_E = NUM_THETAS * NUM_THETAS                  # real flattened ECT image size (S*T)
D_PAD = ((D_E + 127) // 128) * 128             # lane-dense padded ECT width (=128 here, =4096 at full size)
D_IN_PAD = D_PAD + FEATURE_DIM                 # padded MLP input dim (ECT + node features)
C_PAD = 128                                    # lane-dense logits width
NODE_CHUNK = 128                               # nodes per grid step (multiple of 128 lanes;
                                               # size up per-generation VMEM budget at full scale)


def _layer_norm(x, g, b):
    mu = jnp.mean(x, axis=-1, keepdims=True)
    var = jnp.mean(jnp.square(x - mu), axis=-1, keepdims=True)
    return (x - mu) * lax.rsqrt(var + LN_EPS) * g + b


# ----------------------------------------------------------------------------
# Fused kernel: per-chunk ECT partial sum -> (last step) max-normalize + MLP head
# ----------------------------------------------------------------------------
def ect_model_kernel(points_ref, bidx_ref, dirs_ref, lin_ref, feat_ref,
                     w_in_ref, w_hid_ref, vecs_ref, wo_ref, bo_ref,
                     out_ref, ect_acc, *, batch_size):
    step = pl.program_id(0)

    @pl.when(step == 0)
    def _init():
        ect_acc[...] = jnp.zeros_like(ect_acc)

    # ---- ECT partial sum for this node chunk --------------------------------
    # dirs_ref = ECT_SCALE * directions, pre-tiled/zero-padded to (F, D_PAD): the
    # projections land directly in the lane-dense flat (s*T+t) layout, so there is
    # no separate nh / jnp.tile temp.
    nh_tiled = jnp.dot(points_ref[...], dirs_ref[...],
                       preferred_element_type=jnp.float32)            # (TN, D_PAD)
    # lin_ref = ECT_SCALE * lin on real columns, -1e9 on pad columns -> sigmoid = 0
    ecc = jax.nn.sigmoid(lin_ref[...] - nh_tiled)                     # (TN, D_PAD)

    # One-hot membership built in-kernel from int32 graph ids (pad nodes carry
    # id == batch_size, matching no graph -> zero column -> no contribution).
    graph_iota = lax.broadcasted_iota(jnp.int32,
                                      (batch_size, ecc.shape[0]), 0)  # (B, TN)
    memb = jnp.where(graph_iota == bidx_ref[...], 1.0, 0.0).astype(jnp.bfloat16)

    # Segment-sum over nodes: bf16 MXU matmul, f32 accumulation in VMEM scratch.
    ect_acc[...] += jnp.dot(memb, ecc.astype(jnp.bfloat16),
                            preferred_element_type=jnp.float32)       # (B, D_PAD)

    # ---- last node chunk: normalize + residual MLP head ---------------------
    @pl.when(step == pl.num_programs(0) - 1)
    def _head():
        ect = ect_acc[...]
        # EctLayer(normalized=True): divide each graph's ECT image by its max.
        # eps guard avoids inf/NaN for an empty graph; approx reciprocal uses the EUP.
        ect_max = jnp.maximum(jnp.max(ect, axis=-1, keepdims=True), 1e-6)
        ect = ect * pl.reciprocal(ect_max, approx=True)

        feat = feat_ref[...]                                           # (B, F)

        vecs = vecs_ref[...]                                           # (8, H)
        b1, bs1, b2, bs2 = vecs[0:1], vecs[1:2], vecs[2:3], vecs[3:4]
        g1, beta1, g2, beta2 = vecs[4:5], vecs[5:6], vecs[6:7], vecs[7:8]

        # concat(ect, feat) @ W as split matmuls on static ref slices (no concat);
        # the padded ECT rows of w_in are zero, so pad columns never contribute.
        w1e = w_in_ref[0:D_PAD, :]
        w1f = w_in_ref[D_PAD:D_IN_PAD, :]
        ws1e = w_in_ref[D_IN_PAD:D_IN_PAD + D_PAD, :]
        ws1f = w_in_ref[D_IN_PAD + D_PAD:2 * D_IN_PAD, :]
        w2 = w_hid_ref[0:HIDDEN_DIM, :]
        ws2 = w_hid_ref[HIDDEN_DIM:2 * HIDDEN_DIM, :]

        identity = (jnp.dot(ect, ws1e, preferred_element_type=jnp.float32)
                    + jnp.dot(feat, ws1f, preferred_element_type=jnp.float32)
                    + bs1)
        h = (jnp.dot(ect, w1e, preferred_element_type=jnp.float32)
             + jnp.dot(feat, w1f, preferred_element_type=jnp.float32)
             + b1)
        h = jnp.maximum(h, 0.0)
        h = _layer_norm(h + identity, g1, beta1)
        # TODO(synk): nn.Dropout(0.5) is identity in eval mode; train-mode RNG dropout not implemented.

        identity2 = jnp.dot(h, ws2, preferred_element_type=jnp.float32) + bs2
        h2 = jnp.maximum(
            jnp.dot(h, w2, preferred_element_type=jnp.float32) + b2, 0.0)
        h2 = _layer_norm(h2 + identity2, g2, beta2)

        # Lane-dense (B, 128) logits block (wo/bo zero-padded); wrapper slices to 5.
        out_ref[...] = (jnp.dot(h2, wo_ref[...], preferred_element_type=jnp.float32)
                        + bo_ref[...])


# ----------------------------------------------------------------------------
# Wrapper: grid over node chunks; weights / constants loaded once (constant index_map).
# ----------------------------------------------------------------------------
def ect_model_forward(points, batch_index, features, params):
    N, F = points.shape
    B = features.shape[0]

    n_pad = int(pl.cdiv(N, NODE_CHUNK)) * NODE_CHUNK
    pts = jnp.pad(points, ((0, n_pad - N), (0, 0)))
    bidx = jnp.pad(batch_index.astype(jnp.int32), (0, n_pad - N),
                   constant_values=B).reshape(1, n_pad)               # pad nodes -> no graph
    n_steps = n_pad // NODE_CHUNK

    flops = int(2 * n_pad * F * D_PAD                 # projection matmul
                + 2 * B * n_pad * D_PAD               # segment-sum matmul
                + 4 * B * D_IN_PAD * HIDDEN_DIM       # mlp1 + skip1
                + 4 * B * HIDDEN_DIM * HIDDEN_DIM     # mlp2 + skip2
                + 2 * B * HIDDEN_DIM * C_PAD)         # output layer
    bytes_accessed = int(pts.size * 4 + bidx.size * 4 + features.size * 4
                         + sum(int(v.size) * 4 for v in params.values())
                         + B * C_PAD * 4)

    kernel = functools.partial(ect_model_kernel, batch_size=B)
    # TODO(synk): at real batch sizes, add a second "parallel" grid axis over graph
    # blocks (per-graph node ranges via scalar prefetch) to use both v7x TensorCores.
    out = pl.pallas_call(
        kernel,
        out_shape=jax.ShapeDtypeStruct((B, C_PAD), jnp.float32),
        grid=(n_steps,),
        in_specs=[
            pl.BlockSpec((NODE_CHUNK, F), lambda i: (i, 0)),           # points chunk
            pl.BlockSpec((1, NODE_CHUNK), lambda i: (0, i)),           # graph ids chunk
            pl.BlockSpec((F, D_PAD), lambda i: (0, 0)),                # scaled+tiled dirs
            pl.BlockSpec((1, D_PAD), lambda i: (0, 0)),                # scaled filtration lvls
            pl.BlockSpec((B, F), lambda i: (0, 0)),                    # graph features
            pl.BlockSpec((2 * D_IN_PAD, HIDDEN_DIM), lambda i: (0, 0)),  # w_in packed
            pl.BlockSpec((2 * HIDDEN_DIM, HIDDEN_DIM), lambda i: (0, 0)),  # w_hid packed
            pl.BlockSpec((8, HIDDEN_DIM), lambda i: (0, 0)),           # biases + LN params
            pl.BlockSpec((HIDDEN_DIM, C_PAD), lambda i: (0, 0)),       # wo (lane-padded)
            pl.BlockSpec((1, C_PAD), lambda i: (0, 0)),                # bo (lane-padded)
        ],
        out_specs=pl.BlockSpec((B, C_PAD), lambda i: (0, 0)),
        scratch_shapes=[pltpu.VMEM((B, D_PAD), jnp.float32)],          # ECT accumulator
        compiler_params=pltpu.CompilerParams(
            dimension_semantics=("arbitrary",),                       # node axis = reduction
            vmem_limit_bytes=32 * 1024 * 1024),
        cost_estimate=pl.CostEstimate(flops=flops,
                                      transcendentals=int(n_pad * D_PAD),
                                      bytes_accessed=bytes_accessed),
    )(pts, bidx, params["dirs_tiled"], params["lin_pad"], features,
      params["w_in"], params["w_hid"], params["vecs"], params["wo"], params["bo"])
    return out[:, :NUM_CLASSES]


def init_params(key, directions, lin):
    """One-time parameter / constant setup (ECT_SCALE and ECT tiling folded HERE)."""
    ks = jax.random.split(key, 5)

    def linear(k, fan_in, fan_out):
        kw, kb = jax.random.split(k)
        bound = fan_in ** -0.5
        w = jax.random.uniform(kw, (fan_in, fan_out), jnp.float32, -bound, bound)
        b = jax.random.uniform(kb, (1, fan_out), jnp.float32, -bound, bound)
        return w, b

    d_in = D_E + FEATURE_DIM
    w1, b1 = linear(ks[0], d_in, HIDDEN_DIM)          # mlp1
    ws1, bs1 = linear(ks[1], d_in, HIDDEN_DIM)        # skip_connection1
    w2, b2 = linear(ks[2], HIDDEN_DIM, HIDDEN_DIM)    # mlp2
    ws2, bs2 = linear(ks[3], HIDDEN_DIM, HIDDEN_DIM)  # skip_connection2
    wo, bo = linear(ks[4], HIDDEN_DIM, NUM_CLASSES)   # output_layer
    ones = jnp.ones((1, HIDDEN_DIM), jnp.float32)     # LayerNorm gamma
    zeros = jnp.zeros((1, HIDDEN_DIM), jnp.float32)   # LayerNorm beta

    def pad_ect_rows(w):
        # (D_E + F, H) -> (D_PAD + F, H) with zero rows for the padded ECT lanes.
        w_ect = jnp.pad(w[:D_E], ((0, D_PAD - D_E), (0, 0)))
        return jnp.concatenate([w_ect, w[D_E:]], axis=0)

    # EctLayer constants with ECT_SCALE and the (S,T)->s*T+t tiling folded in:
    #   dirs_tiled[f, s*T + t] = ECT_SCALE * directions[f, t]   (0 on pad columns)
    #   lin_pad[0,  s*T + t]  = ECT_SCALE * lin[s]              (-1e9 on pad -> sigmoid 0)
    dirs_tiled = jnp.tile(ECT_SCALE * directions, (1, NUM_THETAS))
    dirs_tiled = jnp.pad(dirs_tiled, ((0, 0), (0, D_PAD - D_E)))
    lin_rep = jnp.repeat(ECT_SCALE * lin, NUM_THETAS)
    lin_pad = jnp.pad(lin_rep, (0, D_PAD - D_E),
                      constant_values=-1e9).reshape(1, D_PAD)

    return dict(
        w_in=jnp.concatenate([pad_ect_rows(w1), pad_ect_rows(ws1)], axis=0),  # (2*D_IN_PAD, H)
        w_hid=jnp.concatenate([w2, ws2], axis=0),                             # (2*H, H)
        vecs=jnp.concatenate([b1, bs1, b2, bs2,
                              ones, zeros, ones, zeros], axis=0),             # (8, H)
        wo=jnp.pad(wo, ((0, 0), (0, C_PAD - NUM_CLASSES))),                   # (H, 128)
        bo=jnp.pad(bo, ((0, 0), (0, C_PAD - NUM_CLASSES))),                   # (1, 128)
        dirs_tiled=dirs_tiled,                                                # (F, D_PAD)
        lin_pad=lin_pad,                                                      # (1, D_PAD)
    )


if __name__ == "__main__":
    B = 2                       # graphs in the batch
    nodes_per_graph = 100
    N = B * nodes_per_graph     # padded to 256 inside the wrapper -> 2 grid steps

    key = jax.random.PRNGKey(0)
    k_pts, k_feat, k_dir, k_par = jax.random.split(key, 4)

    points = jax.random.normal(k_pts, (N, FEATURE_DIM), dtype=jnp.float32)
    features = jax.random.normal(k_feat, (B, FEATURE_DIM), dtype=jnp.float32)
    # torch_geometric `batch.batch`: per-node graph id (int32) — N*4 bytes instead of B*N*4
    batch_index = jnp.repeat(jnp.arange(B, dtype=jnp.int32), nodes_per_graph)

    # deterministic unit projection directions (columns) and filtration levels
    directions = jax.random.normal(k_dir, (FEATURE_DIM, NUM_THETAS), dtype=jnp.float32)
    directions = directions / jnp.linalg.norm(directions, axis=0, keepdims=True)
    lin = jnp.linspace(-1.0, 1.0, NUM_THETAS, dtype=jnp.float32)

    params = init_params(k_par, directions, lin)

    out = ect_model_forward(points, batch_index, features, params)
    out = jax.block_until_ready(out)
    assert out.shape == (B, NUM_CLASSES) and out.dtype == jnp.float32
    assert bool(jnp.all(jnp.isfinite(out)))
    print("KERNEL_OK")
</pallas_src>

<mosaic_0001>
module attributes {stable_mosaic.version = 11 : i64} {
  func.func @ect_model_kernel(%arg0: i32, %arg1: memref<128x16xf32, #tpu.memory_space<vmem>>, %arg2: memref<1x128xi32, #tpu.memory_space<vmem>>, %arg3: memref<16x128xf32, #tpu.memory_space<vmem>>, %arg4: memref<1x128xf32, #tpu.memory_space<vmem>>, %arg5: memref<2x16xf32, #tpu.memory_space<vmem>>, %arg6: memref<288x32xf32, #tpu.memory_space<vmem>>, %arg7: memref<64x32xf32, #tpu.memory_space<vmem>>, %arg8: memref<8x32xf32, #tpu.memory_space<vmem>>, %arg9: memref<32x128xf32, #tpu.memory_space<vmem>>, %arg10: memref<1x128xf32, #tpu.memory_space<vmem>>, %arg11: memref<2x128xf32, #tpu.memory_space<vmem>>, %arg12: memref<2x128xf32, #tpu.memory_space<vmem>>) attributes {dimension_semantics = [#tpu.dimension_semantics<arbitrary>], iteration_bounds = array<i64: 2>, scalar_prefetch = 0 : i64, scratch_operands = 1 : i64, tpu.core_type = #tpu.core_type<tc>, window_params = [{transform_indices = @transform_0, window_bounds = array<i64: 128, 16>}, {transform_indices = @transform_1, window_bounds = array<i64: 1, 128>}, {pipeline_mode = #tpu.pipeline_mode<synchronous>, transform_indices = @transform_2, window_bounds = array<i64: 16, 128>}, {pipeline_mode = #tpu.pipeline_mode<synchronous>, transform_indices = @transform_3, window_bounds = array<i64: 1, 128>}, {pipeline_mode = #tpu.pipeline_mode<synchronous>, transform_indices = @transform_4, window_bounds = array<i64: 2, 16>}, {pipeline_mode = #tpu.pipeline_mode<synchronous>, transform_indices = @transform_5, window_bounds = array<i64: 288, 32>}, {pipeline_mode = #tpu.pipeline_mode<synchronous>, transform_indices = @transform_6, window_bounds = array<i64: 64, 32>}, {pipeline_mode = #tpu.pipeline_mode<synchronous>, transform_indices = @transform_7, window_bounds = array<i64: 8, 32>}, {pipeline_mode = #tpu.pipeline_mode<synchronous>, transform_indices = @transform_8, window_bounds = array<i64: 32, 128>}, {pipeline_mode = #tpu.pipeline_mode<synchronous>, transform_indices = @transform_9, window_bounds = array<i64: 1, 128>}, {pipeline_mode = #tpu.pipeline_mode<synchronous>, transform_indices = @transform_10, window_bounds = array<i64: 2, 128>}]} {
    %c0_i32 = arith.constant 0 : i32
    %0 = arith.cmpi eq, %arg0, %c0_i32 : i32
    %1 = arith.extui %0 : i1 to i32
    %c0_i32_0 = arith.constant 0 : i32
    %2 = arith.cmpi ne, %1, %c0_i32_0 : i32
    scf.if %2 {
      %cst_17 = arith.constant 0.000000e+00 : f32
      %30 = vector.broadcast %cst_17 : f32 to vector<2x128xf32>
      %c0_18 = arith.constant 0 : index
      %c0_19 = arith.constant 0 : index
      %31 = vector.load %arg12[%c0_18, %c0_19] : memref<2x128xf32, #tpu.memory_space<vmem>>, vector<2x128xf32>
      tpu.vector_store %arg12[%c0_18, %c0_19], %30 {strides = array<i32>} : memref<2x128xf32, #tpu.memory_space<vmem>>, vector<2x128xf32>,
    } else {
    }
    %c0 = arith.constant 0 : index
    %c0_1 = arith.constant 0 : index
    %3 = vector.load %arg1[%c0, %c0_1] : memref<128x16xf32, #tpu.memory_space<vmem>>, vector<128x16xf32>
    %c0_2 = arith.constant 0 : index
    %c0_3 = arith.constant 0 : index
    %4 = vector.load %arg3[%c0_2, %c0_3] : memref<16x128xf32, #tpu.memory_space<vmem>>, vector<16x128xf32>
    %cst = arith.constant dense<0.000000e+00> : vector<128x128xf32>
    %5 = tpu.matmul %3, %4, %cst {dimension_numbers = #tpu.dot_dimension_numbers<[1], [0], [0], [1], [0, 0, 1, 1], [], []>} : vector<128x16xf32>, vector<16x128xf32>, vector<128x128xf32> -> vector<128x128xf32>
    %c0_4 = arith.constant 0 : index
    %c0_5 = arith.constant 0 : index
    %6 = vector.load %arg4[%c0_4, %c0_5] : memref<1x128xf32, #tpu.memory_space<vmem>>, vector<1x128xf32>
    %7 = vector.broadcast %6 : vector<1x128xf32> to vector<128x128xf32>
    %8 = arith.subf %7, %5 : vector<128x128xf32>
    %9 = arith.negf %8 : vector<128x128xf32>
    %10 = math.exp %9 : vector<128x128xf32>
    %cst_6 = arith.constant 1.000000e+00 : f32
    %11 = vector.broadcast %cst_6 : f32 to vector<128x128xf32>
    %12 = arith.addf %11, %10 : vector<128x128xf32>
    %13 = arith.divf %11, %12 : vector<128x128xf32>
    %14 = tpu.iota {dimensions = array<i32: 0>} : vector<2x128xi32>
    %c0_7 = arith.constant 0 : index
    %c0_8 = arith.constant 0 : index
    %15 = vector.load %arg2[%c0_7, %c0_8] : memref<1x128xi32, #tpu.memory_space<vmem>>, vector<1x128xi32>
    %16 = vector.broadcast %15 : vector<1x128xi32> to vector<2x128xi32>
    %17 = arith.cmpi eq, %14, %16 : vector<2x128xi32>
    %cst_9 = arith.constant 1.000000e+00 : f32
    %cst_10 = arith.constant 0.000000e+00 : f32
    %18 = vector.broadcast %cst_9 : f32 to vector<2x128xf32>
    %19 = vector.broadcast %cst_10 : f32 to vector<2x128xf32>
    %20 = arith.select %17, %18, %19 : vector<2x128xi1>, vector<2x128xf32>
    %21 = arith.truncf %20 : vector<2x128xf32> to vector<2x128xbf16>
    %c0_11 = arith.constant 0 : index
    %c0_12 = arith.constant 0 : index
    %22 = vector.load %arg12[%c0_11, %c0_12] : memref<2x128xf32, #tpu.memory_space<vmem>>, vector<2x128xf32>
    %23 = arith.truncf %13 : vector<128x128xf32> to vector<128x128xbf16>
    %cst_13 = arith.constant dense<0.000000e+00> : vector<2x128xf32>
    %24 = tpu.matmul %21, %23, %cst_13 {dimension_numbers = #tpu.dot_dimension_numbers<[1], [0], [0], [1], [0, 0, 1, 1], [], []>} : vector<2x128xbf16>, vector<128x128xbf16>, vector<2x128xf32> -> vector<2x128xf32>
    %25 = arith.addf %22, %24 : vector<2x128xf32>
    %c0_14 = arith.constant 0 : index
    %c0_15 = arith.constant 0 : index
    %26 = vector.load %arg12[%c0_14, %c0_15] : memref<2x128xf32, #tpu.memory_space<vmem>>, vector<2x128xf32>
    tpu.vector_store %arg12[%c0_14, %c0_15], %25 {strides = array<i32>} : memref<2x128xf32, #tpu.memory_space<vmem>>, vector<2x128xf32>,
    %c1_i32 = arith.constant 1 : i32
    %27 = arith.cmpi eq, %arg0, %c1_i32 : i32
    %28 = arith.extui %27 : i1 to i32
    %c0_i32_16 = arith.constant 0 : i32
    %29 = arith.cmpi ne, %28, %c0_i32_16 : i32
    scf.if %29 {
      %c0_17 = arith.constant 0 : index
      %c0_18 = arith.constant 0 : index
      %30 = vector.load %arg12[%c0_17, %c0_18] : memref<2x128xf32, #tpu.memory_space<vmem>>, vector<2x128xf32>
      %cst_19 = arith.constant dense<0xFF800000> : vector<2xf32>
      %31 = vector.multi_reduction <maximumf>, %30, %cst_19 [1] : vector<2x128xf32> to vector<2xf32>
      %32 = vector.shape_cast %31 : vector<2xf32> to vector<2x1xf32>
      %cst_20 = arith.constant 9.99999997E-7 : f32
      %33 = vector.broadcast %cst_20 : f32 to vector<2x1xf32>
      %34 = arith.maximumf %32, %33 : vector<2x1xf32>
      %35 = tpu.reciprocal %34 {approx = true} : vector<2x1xf32> -> vector<2x1xf32>
      %36 = vector.broadcast %35 : vector<2x1xf32> to vector<2x128xf32>
      %37 = arith.mulf %30, %36 : vector<2x128xf32>
      %c0_21 = arith.constant 0 : index
      %c0_22 = arith.constant 0 : index
      %38 = vector.load %arg5[%c0_21, %c0_22] : memref<2x16xf32, #tpu.memory_space<vmem>>, vector<2x16xf32>
      %c0_23 = arith.constant 0 : index
      %c0_24 = arith.constant 0 : index
      %39 = vector.load %arg8[%c0_23, %c0_24] : memref<8x32xf32, #tpu.memory_space<vmem>>, vector<8x32xf32>
      %40 = vector.extract_strided_slice %39 {offsets = [0, 0], sizes = [1, 32], strides = [1, 1]} : vector<8x32xf32> to vector<1x32xf32>
      %41 = vector.extract_strided_slice %39 {offsets = [1, 0], sizes = [1, 32], strides = [1, 1]} : vector<8x32xf32> to vector<1x32xf32>
      %42 = vector.extract_strided_slice %39 {offsets = [2, 0], sizes = [1, 32], strides = [1, 1]} : vector<8x32xf32> to vector<1x32xf32>
      %43 = vector.extract_strided_slice %39 {offsets = [3, 0], sizes = [1, 32], strides = [1, 1]} : vector<8x32xf32> to vector<1x32xf32>
      %44 = vector.extract_strided_slice %39 {offsets = [4, 0], sizes = [1, 32], strides = [1, 1]} : vector<8x32xf32> to vector<1x32xf32>
      %45 = vector.extract_strided_slice %39 {offsets = [5, 0], sizes = [1, 32], strides = [1, 1]} : vector<8x32xf32> to vector<1x32xf32>
      %46 = vector.extract_strided_slice %39 {offsets = [6, 0], sizes = [1, 32], strides = [1, 1]} : vector<8x32xf32> to vector<1x32xf32>
      %47 = vector.extract_strided_slice %39 {offsets = [7, 0], sizes = [1, 32], strides = [1, 1]} : vector<8x32xf32> to vector<1x32xf32>
      %c0_25 = arith.constant 0 : index
      %c0_26 = arith.constant 0 : index
      %48 = vector.load %arg6[%c0_25, %c0_26] : memref<288x32xf32, #tpu.memory_space<vmem>>, vector<128x32xf32>
      %c128 = arith.constant 128 : index
      %c0_27 = arith.constant 0 : index
      %49 = vector.load %arg6[%c128, %c0_27] : memref<288x32xf32, #tpu.memory_space<vmem>>, vector<16x32xf32>
      %c144 = arith.constant 144 : index
      %c0_28 = arith.constant 0 : index
      %50 = vector.load %arg6[%c144, %c0_28] : memref<288x32xf32, #tpu.memory_space<vmem>>, vector<128x32xf32>
      %c272 = arith.constant 272 : index
      %c0_29 = arith.constant 0 : index
      %51 = vector.load %arg6[%c272, %c0_29] : memref<288x32xf32, #tpu.memory_space<vmem>>, vector<16x32xf32>
      %c0_30 = arith.constant 0 : index
      %c0_31 = arith.constant 0 : index
      %52 = vector.load %arg7[%c0_30, %c0_31] : memref<64x32xf32, #tpu.memory_space<vmem>>, vector<32x32xf32>
      %c32 = arith.constant 32 : index
      %c0_32 = arith.constant 0 : index
      %53 = vector.load %arg7[%c32, %c0_32] : memref<64x32xf32, #tpu.memory_space<vmem>>, vector<32x32xf32>
      %cst_33 = arith.constant dense<0.000000e+00> : vector<2x32xf32>
      %54 = tpu.matmul %37, %50, %cst_33 {dimension_numbers = #tpu.dot_dimension_numbers<[1], [0], [0], [1], [0, 0, 1, 1], [], []>} : vector<2x128xf32>, vector<128x32xf32>, vector<2x32xf32> -> vector<2x32xf32>
      %cst_34 = arith.constant dense<0.000000e+00> : vector<2x32xf32>
      %55 = tpu.matmul %38, %51, %cst_34 {dimension_numbers = #tpu.dot_dimension_numbers<[1], [0], [0], [1], [0, 0, 1, 1], [], []>} : vector<2x16xf32>, vector<16x32xf32>, vector<2x32xf32> -> vector<2x32xf32>
      %56 = arith.addf %54, %55 : vector<2x32xf32>
      %57 = vector.broadcast %41 : vector<1x32xf32> to vector<2x32xf32>
      %58 = arith.addf %56, %57 : vector<2x32xf32>
      %cst_35 = arith.constant dense<0.000000e+00> : vector<2x32xf32>
      %59 = tpu.matmul %37, %48, %cst_35 {dimension_numbers = #tpu.dot_dimension_numbers<[1], [0], [0], [1], [0, 0, 1, 1], [], []>} : vector<2x128xf32>, vector<128x32xf32>, vector<2x32xf32> -> vector<2x32xf32>
      %cst_36 = arith.constant dense<0.000000e+00> : vector<2x32xf32>
      %60 = tpu.matmul %38, %49, %cst_36 {dimension_numbers = #tpu.dot_dimension_numbers<[1], [0], [0], [1], [0, 0, 1, 1], [], []>} : vector<2x16xf32>, vector<16x32xf32>, vector<2x32xf32> -> vector<2x32xf32>
      %61 = arith.addf %59, %60 : vector<2x32xf32>
      %62 = vector.broadcast %40 : vector<1x32xf32> to vector<2x32xf32>
      %63 = arith.addf %61, %62 : vector<2x32xf32>
      %cst_37 = arith.constant 0.000000e+00 : f32
      %64 = vector.broadcast %cst_37 : f32 to vector<2x32xf32>
      %65 = arith.maximumf %63, %64 : vector<2x32xf32>
      %66 = arith.addf %65, %58 : vector<2x32xf32>
      %cst_38 = arith.constant dense<0.000000e+00> : vector<2xf32>
      %67 = vector.multi_reduction <add>, %66, %cst_38 [1] : vector<2x32xf32> to vector<2xf32>
      %68 = vector.shape_cast %67 : vector<2xf32> to vector<2x1xf32>
      %cst_39 = arith.constant 3.200000e+01 : f32
      %69 = vector.broadcast %cst_39 : f32 to vector<2x1xf32>
      %70 = arith.divf %68, %69 : vector<2x1xf32>
      %71 = vector.broadcast %70 : vector<2x1xf32> to vector<2x32xf32>
      %72 = arith.subf %66, %71 : vector<2x32xf32>
      %73 = arith.mulf %72, %72 : vector<2x32xf32>
      %cst_40 = arith.constant dense<0.000000e+00> : vector<2xf32>
      %74 = vector.multi_reduction <add>, %73, %cst_40 [1] : vector<2x32xf32> to vector<2xf32>
      %75 = vector.shape_cast %74 : vector<2xf32> to vector<2x1xf32>
      %cst_41 = arith.constant 3.200000e+01 : f32
      %76 = vector.broadcast %cst_41 : f32 to vector<2x1xf32>
      %77 = arith.divf %75, %76 : vector<2x1xf32>
      %78 = vector.broadcast %70 : vector<2x1xf32> to vector<2x32xf32>
      %79 = arith.subf %66, %78 : vector<2x32xf32>
      %cst_42 = arith.constant 9.99999974E-6 : f32
      %80 = vector.broadcast %cst_42 : f32 to vector<2x1xf32>
      %81 = arith.addf %77, %80 : vector<2x1xf32>
      %82 = math.rsqrt %81 : vector<2x1xf32>
      %83 = vector.broadcast %82 : vector<2x1xf32> to vector<2x32xf32>
      %84 = arith.mulf %79, %83 : vector<2x32xf32>
      %85 = vector.broadcast %44 : vector<1x32xf32> to vector<2x32xf32>
      %86 = arith.mulf %84, %85 : vector<2x32xf32>
      %87 = vector.broadcast %45 : vector<1x32xf32> to vector<2x32xf32>
      %88 = arith.addf %86, %87 : vector<2x32xf32>
      %cst_43 = arith.constant dense<0.000000e+00> : vector<2x32xf32>
      %89 = tpu.matmul %88, %53, %cst_43 {dimension_numbers = #tpu.dot_dimension_numbers<[1], [0], [0], [1], [0, 0, 1, 1], [], []>} : vector<2x32xf32>, vector<32x32xf32>, vector<2x32xf32> -> vector<2x32xf32>
      %90 = vector.broadcast %43 : vector<1x32xf32> to vector<2x32xf32>
      %91 = arith.addf %89, %90 : vector<2x32xf32>
      %cst_44 = arith.constant dense<0.000000e+00> : vector<2x32xf32>
      %92 = tpu.matmul %88, %52, %cst_44 {dimension_numbers = #tpu.dot_dimension_numbers<[1], [0], [0], [1], [0, 0, 1, 1], [], []>} : vector<2x32xf32>, vector<32x32xf32>, vector<2x32xf32> -> vector<2x32xf32>
      %93 = vector.broadcast %42 : vector<1x32xf32> to vector<2x32xf32>
      %94 = arith.addf %92, %93 : vector<2x32xf32>
      %cst_45 = arith.constant 0.000000e+00 : f32
      %95 = vector.broadcast %cst_45 : f32 to vector<2x32xf32>
      %96 = arith.maximumf %94, %95 : vector<2x32xf32>
      %97 = arith.addf %96, %91 : vector<2x32xf32>
      %cst_46 = arith.constant dense<0.000000e+00> : vector<2xf32>
      %98 = vector.multi_reduction <add>, %97, %cst_46 [1] : vector<2x32xf32> to vector<2xf32>
      %99 = vector.shape_cast %98 : vector<2xf32> to vector<2x1xf32>
      %cst_47 = arith.constant 3.200000e+01 : f32
      %100 = vector.broadcast %cst_47 : f32 to vector<2x1xf32>
      %101 = arith.divf %99, %100 : vector<2x1xf32>
      %102 = vector.broadcast %101 : vector<2x1xf32> to vector<2x32xf32>
      %103 = arith.subf %97, %102 : vector<2x32xf32>
      %104 = arith.mulf %103, %103 : vector<2x32xf32>
      %cst_48 = arith.constant dense<0.000000e+00> : vector<2xf32>
      %105 = vector.multi_reduction <add>, %104, %cst_48 [1] : vector<2x32xf32> to vector<2xf32>
      %106 = vector.shape_cast %105 : vector<2xf32> to vector<2x1xf32>
      %cst_49 = arith.constant 3.200000e+01 : f32
      %107 = vector.broadcast %cst_49 : f32 to vector<2x1xf32>
      %108 = arith.divf %106, %107 : vector<2x1xf32>
      %109 = vector.broadcast %101 : vector<2x1xf32> to vector<2x32xf32>
      %110 = arith.subf %97, %109 : vector<2x32xf32>
      %cst_50 = arith.constant 9.99999974E-6 : f32
      %111 = vector.broadcast %cst_50 : f32 to vector<2x1xf32>
      %112 = arith.addf %108, %111 : vector<2x1xf32>
      %113 = math.rsqrt %112 : vector<2x1xf32>
      %114 = vector.broadcast %113 : vector<2x1xf32> to vector<2x32xf32>
      %115 = arith.mulf %110, %114 : vector<2x32xf32>
      %116 = vector.broadcast %46 : vector<1x32xf32> to vector<2x32xf32>
      %117 = arith.mulf %115, %116 : vector<2x32xf32>
      %118 = vector.broadcast %47 : vector<1x32xf32> to vector<2x32xf32>
      %119 = arith.addf %117, %118 : vector<2x32xf32>
      %c0_51 = arith.constant 0 : index
      %c0_52 = arith.constant 0 : index
      %120 = vector.load %arg9[%c0_51, %c0_52] : memref<32x128xf32, #tpu.memory_space<vmem>>, vector<32x128xf32>
      %cst_53 = arith.constant dense<0.000000e+00> : vector<2x128xf32>
      %121 = tpu.matmul %119, %120, %cst_53 {dimension_numbers = #tpu.dot_dimension_numbers<[1], [0], [0], [1], [0, 0, 1, 1], [], []>} : vector<2x32xf32>, vector<32x128xf32>, vector<2x128xf32> -> vector<2x128xf32>
      %c0_54 = arith.constant 0 : index
      %c0_55 = arith.constant 0 : index
      %122 = vector.load %arg10[%c0_54, %c0_55] : memref<1x128xf32, #tpu.memory_space<vmem>>, vector<1x128xf32>
      %123 = vector.broadcast %122 : vector<1x128xf32> to vector<2x128xf32>
      %124 = arith.addf %121, %123 : vector<2x128xf32>
      %c0_56 = arith.constant 0 : index
      %c0_57 = arith.constant 0 : index
      %125 = vector.load %arg11[%c0_56, %c0_57] : memref<2x128xf32, #tpu.memory_space<vmem>>, vector<2x128xf32>
      tpu.vector_store %arg11[%c0_56, %c0_57], %124 {strides = array<i32>} : memref<2x128xf32, #tpu.memory_space<vmem>>, vector<2x128xf32>,
    } else {
    }
    return
  }
  func.func @transform_0(%arg0: i32) -> (i32, i32) {
    %c0_i32 = arith.constant 0 : i32
    %c0_i32_0 = arith.constant 0 : i32
    return %arg0, %c0_i32 : i32, i32
  }
  func.func @transform_1(%arg0: i32) -> (i32, i32) {
    %c0_i32 = arith.constant 0 : i32
    %c0_i32_0 = arith.constant 0 : i32
    return %c0_i32, %arg0 : i32, i32
  }
  func.func @transform_2(%arg0: i32) -> (i32, i32) {
    %c0_i32 = arith.constant 0 : i32
    %c0_i32_0 = arith.constant 0 : i32
    %c0_i32_1 = arith.constant 0 : i32
    return %c0_i32, %c0_i32_0 : i32, i32
  }
  func.func @transform_3(%arg0: i32) -> (i32, i32) {
    %c0_i32 = arith.constant 0 : i32
    %c0_i32_0 = arith.constant 0 : i32
    %c0_i32_1 = arith.constant 0 : i32
    return %c0_i32, %c0_i32_0 : i32, i32
  }
  func.func @transform_4(%arg0: i32) -> (i32, i32) {
    %c0_i32 = arith.constant 0 : i32
    %c0_i32_0 = arith.constant 0 : i32
    %c0_i32_1 = arith.constant 0 : i32
    return %c0_i32, %c0_i32_0 : i32, i32
  }
  func.func @transform_5(%arg0: i32) -> (i32, i32) {
    %c0_i32 = arith.constant 0 : i32
    %c0_i32_0 = arith.constant 0 : i32
    %c0_i32_1 = arith.constant 0 : i32
    return %c0_i32, %c0_i32_0 : i32, i32
  }
  func.func @transform_6(%arg0: i32) -> (i32, i32) {
    %c0_i32 = arith.constant 0 : i32
    %c0_i32_0 = arith.constant 0 : i32
    %c0_i32_1 = arith.constant 0 : i32
    return %c0_i32, %c0_i32_0 : i32, i32
  }
  func.func @transform_7(%arg0: i32) -> (i32, i32) {
    %c0_i32 = arith.constant 0 : i32
    %c0_i32_0 = arith.constant 0 : i32
    %c0_i32_1 = arith.constant 0 : i32
    return %c0_i32, %c0_i32_0 : i32, i32
  }
  func.func @transform_8(%arg0: i32) -> (i32, i32) {
    %c0_i32 = arith.constant 0 : i32
    %c0_i32_0 = arith.constant 0 : i32
    %c0_i32_1 = arith.constant 0 : i32
    return %c0_i32, %c0_i32_0 : i32, i32
  }
  func.func @transform_9(%arg0: i32) -> (i32, i32) {
    %c0_i32 = arith.constant 0 : i32
    %c0_i32_0 = arith.constant 0 : i32
    %c0_i32_1 = arith.constant 0 : i32
    return %c0_i32, %c0_i32_0 : i32, i32
  }
  func.func @transform_10(%arg0: i32) -> (i32, i32) {
    %c0_i32 = arith.constant 0 : i32
    %c0_i32_0 = arith.constant 0 : i32
    %c0_i32_1 = arith.constant 0 : i32
    return %c0_i32, %c0_i32_0 : i32, i32
  }
}

</mosaic_0001>

<bundles_post_ra>
// kernel: tpu_custom_call.1
= control target key start
LH: loop header
LB: loop body
LE: loop exit
PB: predicated region body
PF: predicated region fallthrough
CT: control target
= control target key end

     0   :  { %15 = vsyncpa [#allocation4], 0  ;;  %s2025_s13 = smov 0   ;;  %s2375_s0 = inlined_call_operand.vmem [shape: f32[256,16], index: 0, kind: input, shape index: {}]   ;;  %s2376_s1 = inlined_call_operand.vmem [shape: s32[1,256], index: 1, kind: input, shape index: {}]   ;;  %s2377_s2 = inlined_call_operand.vmem [shape: f32[16,128], index: 2, kind: input, shape index: {}]   ;;  %s2378_s3 = inlined_call_operand.vmem [shape: f32[1,128], index: 3, kind: input, shape index: {}]   ;;  %s2379_s4 = inlined_call_operand.vmem [shape: f32[2,16], index: 4, kind: input, shape index: {}]   ;;  %s2380_s5 = inlined_call_operand.vmem [shape: f32[288,32], index: 5, kind: input, shape index: {}]   ;;  %s2381_s6 = inlined_call_operand.vmem [shape: f32[64,32], index: 6, kind: input, shape index: {}]   ;;  %s2382_s7 = inlined_call_operand.vmem [shape: f32[8,32], index: 7, kind: input, shape index: {}]   ;;  %s2383_s8 = inlined_call_operand.vmem [shape: f32[32,128], index: 8, kind: input, shape index: {}]   ;;  %s2384_s9 = inlined_call_operand.vmem [shape: f32[1,128], index: 9, kind: input, shape index: {}]   ;;  %s2385_s10 = inlined_call_operand.hbm [shape: f32[2,128], index: 10, kind: output, shape index: {}]  }
   0x1 LB: > { %s2031_s14 = sadd.s32 4294967295, %s1960_s13   ;;  %p1458_p0 = scmp.ge.s32.totalorder %s1960_s13, 1  ;;  %s1960_s13 = sphi %s2025_s13, %s21_s13  }
   0x2   : > { %p317_p1 = scmp.lt.s32.totalorder %s1960_s13, 3 }
   0x4   : > { %p318_p2 = pnand %p1458_p0, %p317_p1 }
   0x5   : > { %s1459_s15 = sshll.u32 (!%p318_p2), %s2031_s14, 4  ;;  %p359_p3 = scmp.lt.s32.totalorder (!%p318_p2), %s2031_s14, 1 }
   0x6   : > { %321 = sbr.rel (%p318_p2) target bundleno = 1988 (0x7c4), region = 60  ;;  %p354_p4 = scmp.lt.s32.totalorder (!%p318_p2), %s1459_s15, 31 }
   0x7   : > { %p1461_p5 = scmp.ne.s32.totalorder (!%p318_p2), %s2031_s14, 0 }
   0xd   : > { %s2038_s16 = scalar_select %p359_p3, %s2031_s14, 1 }
   0xe   : > { %s2387_s15 = smov (!%p354_p4, %s1459_s15), 31  ;;  %366 = sbr.rel (%p1461_p5) target bundleno = 21 (0x15), region = 64 }
   0xf   : > { %s361_s19 = scalar_lea.vmem %s2376_s1, %s2038_s16  ;;  %s1460_s20 = sshll.u32 %s2387_s15, 3  ;;  %v1962_v0 = vmov (!%p1461_p5), 0.0  }
  0x10   : > { %s2047_s23 = scalar_lea.vmem %s2375_s0, %s1460_s20  ;;  %367 = vst [vmem:[#allocation2] sm:$0x3] (!%p1461_p5), %v1962_v0 }
  0x15 PF: > { %v384_v1 = vld [vmem:[%s2377_s2] sm:$0xff]  ;;  %v385_v2 = vld [vmem:[%s2377_s2 + $0x8] sm:$0xff]  ;;  %vm386_vm0 = vcmask 130048   ;;  %v370_v6 = vld [vmem:[%s2047_s23 + $0x10] sm:$0xff]  ;;  %v1963_v20 = vmov 0.0   ;;  %vm1964_vm1 = vmmov 0  }
  0x16   : > { %v368_v3 = vld [vmem:[%s2047_s23] sm:$0xff]  ;;  %v1756_v4 = vpack.c.bf16 %v385_v2, %v384_v1  ;;  %v369_v5 = vld [vmem:[%s2047_s23 + $0x8] sm:$0xff]  ;;  %v371_v7 = vld [vmem:[%s2047_s23 + $0x18] sm:$0xff]  ;;  %1619 = vmatprep.subr.bf16.mxu1 %v1963_v20  ;;  %1635 = vmatprep.mubr.msk.bf16.mxu1 %vm1964_vm1, %v1963_v20  ;;  %p1498_p6 = scmp.ne.s32.totalorder %s2031_s14, 1 }
  0x17   : > { %1595 = vmatprep.mubr.msk.f32.mxu0 %vm386_vm0, %v368_v3  ;;  %v372_v8 = vld [vmem:[%s2047_s23 + $0x20] sm:$0xff]  ;;  %v373_v9 = vld [vmem:[%s2047_s23 + $0x28] sm:$0xff]  ;;  %v374_v10 = vld [vmem:[%s2047_s23 + $0x30] sm:$0xff]  ;;  %vm765_vm4 = vcmask (!%p1498_p6), 1041408   ;;  %vm1967_vm5 = vmmov (!%p1498_p6), 0   ;;  %vm1113_vm6 = vcmask (!%p1498_p6), 254976  }
  0x18   : > { %1757 = vmatprep.subr.bf16.mxu0 %v1756_v4  ;;  %v375_v11 = vld [vmem:[%s2047_s23 + $0x38] sm:$0xff]  ;;  %v376_v12 = vld [vmem:[%s2047_s23 + $0x40] sm:$0xff]  ;;  %v377_v13 = vld [vmem:[%s2047_s23 + $0x48] sm:$0xff]  ;;  %vm1142_vm7 = vcmask (!%p1498_p6), 261120  }
  0x19   : > { %1759 = vmatpush3.bf16.msra.mxu0 %v1756_v4  ;;  %v378_v14 = vld [vmem:[%s2047_s23 + $0x50] sm:$0xff]  ;;  %v379_v15 = vld [vmem:[%s2047_s23 + $0x58] sm:$0xff]  ;;  %v380_v16 = vld [vmem:[%s2047_s23 + $0x60] sm:$0xff] }
  0x1a   : > { %v381_v17 = vld [vmem:[%s2047_s23 + $0x68] sm:$0xff]  ;;  %v382_v18 = vld [vmem:[%s2047_s23 + $0x70] sm:$0xff]  ;;  %v383_v19 = vld [vmem:[%s2047_s23 + $0x78] sm:$0xff] }
  0x1b   : > { %v2093_v21 = vld [vmem:[%s2378_s3] ss:$0 sm:$0xff] }
  0x1c   : > { %1596 = vmatmul.mubr.msk.f32.vlgmr.msra.gmra.mrb[0].mxu0 %vm386_vm0, %v369_v5 }
  0x1d   : > { %1598 = vmatprep.mubr.msk.f32.mxu0 %vm386_vm0, %v370_v6 }
  0x20   : > { %1599 = vmatmul.mubr.msk.f32.gmra.mrb[2].mxu0 %vm386_vm0, %v371_v7 }
  0x21   : > { %1601 = vmatprep.mubr.msk.f32.mxu0 %vm386_vm0, %v372_v8 }
  0x24   : > { %1602 = vmatmul.mubr.msk.f32.gmra.mrb[4].mxu0 %vm386_vm0, %v373_v9 }
  0x25   : > { %1604 = vmatprep.mubr.msk.f32.mxu0 %vm386_vm0, %v374_v10 }
  0x28   : > { %1605 = vmatmul.mubr.msk.f32.gmra.mrb[6].mxu0 %vm386_vm0, %v375_v11 }
  0x29   : > { %1607 = vmatprep.mubr.msk.f32.mxu0 %vm386_vm0, %v376_v12 }
  0x2c   : > { %1608 = vmatmul.mubr.msk.f32.gmra.mrb[8].mxu0 %vm386_vm0, %v377_v13 }
  0x2d   : > { %1610 = vmatprep.mubr.msk.f32.mxu0 %vm386_vm0, %v378_v14 }
  0x30   : > { %1611 = vmatmul.mubr.msk.f32.gmra.mrb[10].mxu0 %vm386_vm0, %v379_v15 }
  0x31   : > { %1613 = vmatprep.mubr.msk.f32.mxu0 %vm386_vm0, %v380_v16 }
  0x34   : > { %1614 = vmatmul.mubr.msk.f32.gmra.mrb[12].mxu0 %vm386_vm0, %v381_v17 }
  0x35   : > { %1616 = vmatprep.mubr.msk.f32.mxu0 %vm386_vm0, %v382_v18 }
  0x38   : > { %1617 = vmatmul.mubr.msk.f32.gmra.mrb[14].mxu0 %vm386_vm0, %v383_v19 }
  0xef   : > { %v1597_v22 = vpop.f32.mrb[0].mxu0 }
  0xf0   : > { %v588_v23 = vsub.f32 %v2093_v21, %v1597_v22  ;;  %v501_v24 = vpop.f32.mrb[1].mxu0 }
  0xf1   : > { %v587_v25 = vsub.f32 %v2093_v21, %v501_v24 }
  0xf2   : > { %v1480_v26 = vmul.f32 -1.442695, %v588_v23 }
  0xf3   : > { %v1479_v27 = vmul.f32 -1.442695, %v587_v25  ;;  %v1600_v28 = vpop.f32.mrb[2].mxu0 }
  0xf4   : > { %1854 = vpow2.f32 %v1480_v26  ;;  %v590_v29 = vsub.f32 %v2093_v21, %v1600_v28  ;;  %v511_v30 = vpop.f32.mrb[3].mxu0 }
  0xf5   : > { %1856 = vpow2.f32 %v1479_v27  ;;  %v589_v31 = vsub.f32 %v2093_v21, %v511_v30 }
  0xf6   : > { %v1482_v32 = vmul.f32 -1.442695, %v590_v29 }
  0xf7   : > { %v1481_v33 = vmul.f32 -1.442695, %v589_v31  ;;  %v1603_v34 = vpop.f32.mrb[4].mxu0 }
  0xf8   : > { %1858 = vpow2.f32 %v1482_v32  ;;  %v592_v35 = vsub.f32 %v2093_v21, %v1603_v34  ;;  %v521_v36 = vpop.f32.mrb[5].mxu0 }
  0xf9   : > { %1860 = vpow2.f32 %v1481_v33  ;;  %v591_v37 = vsub.f32 %v2093_v21, %v521_v36 }
  0xfa   : > { %v1484_v38 = vmul.f32 -1.442695, %v592_v35 }
  0xfb   : > { %v1483_v39 = vmul.f32 -1.442695, %v591_v37  ;;  %v1606_v40 = vpop.f32.mrb[6].mxu0 }
  0xfc   : > { %1862 = vpow2.f32 %v1484_v38  ;;  %v594_v41 = vsub.f32 %v2093_v21, %v1606_v40  ;;  %v531_v42 = vpop.f32.mrb[7].mxu0 }
  0xfd   : > { %1864 = vpow2.f32 %v1483_v39  ;;  %v593_v43 = vsub.f32 %v2093_v21, %v531_v42 }
  0xfe   : > { %v1855_v44 = vpop.eup %1854  ;;  %v1486_v45 = vmul.f32 -1.442695, %v594_v41 }
  0xff   : > { %v1857_v46 = vpop.eup %1856  ;;  %v652_v47 = vadd.f32 1.0, %v1855_v44  ;;  %v1485_v48 = vmul.f32 -1.442695, %v593_v43  ;;  %v1609_v49 = vpop.f32.mrb[8].mxu0 }
 0x100   : > { %v651_v50 = vadd.f32 1.0, %v1857_v46  ;;  %1866 = vpow2.f32 %v1486_v45  ;;  %v596_v51 = vsub.f32 %v2093_v21, %v1609_v49  ;;  %v541_v52 = vpop.f32.mrb[9].mxu0 }
 0x101   : > { %1868 = vrcp.f32 %v652_v47  ;;  %v595_v53 = vsub.f32 %v2093_v21, %v541_v52 }
 0x102   : > { %v1859_v54 = vpop.eup %1858  ;;  %1870 = vrcp.f32 %v651_v50  ;;  %v1488_v55 = vmul.f32 -1.442695, %v596_v51 }
 0x103   : > { %v1861_v56 = vpop.eup %1860  ;;  %v654_v57 = vadd.f32 1.0, %v1859_v54  ;;  %1872 = vpow2.f32 %v1485_v48  ;;  %v1487_v58 = vmul.f32 -1.442695, %v595_v53  ;;  %v1612_v59 = vpop.f32.mrb[10].mxu0 }
 0x104   : > { %v653_v60 = vadd.f32 1.0, %v1861_v56  ;;  %1874 = vpow2.f32 %v1488_v55  ;;  %v598_v61 = vsub.f32 %v2093_v21, %v1612_v59  ;;  %v551_v62 = vpop.f32.mrb[11].mxu0  ;;  %v699_v56 = vlaneseq }
 0x105   : > { %1876 = vrcp.f32 %v654_v57  ;;  %v597_v63 = vsub.f32 %v2093_v21, %v551_v62  ;;  %v1495_v62 = vld [vmem:[%s361_s19] ss:$0 sm:$0xff] }
 0x106   : > { %v1863_v0 = vpop.eup %1862  ;;  %1878 = vrcp.f32 %v653_v60  ;;  %v1490_v1 = vmul.f32 -1.442695, %v598_v61  ;;  %v2117_v61 = vshrl.u32 %v699_v56, 7  ;;  %v785_v56 = vld [vmem:[%s2380_s5 + $0x58] sm:$0xff] (!%p1498_p6) }
 0x107   : > { %v1865_v2 = vpop.eup %1864  ;;  %v656_v3 = vadd.f32 1.0, %v1863_v0  ;;  %1880 = vpow2.f32 %v1487_v58  ;;  %v1489_v4 = vmul.f32 -1.442695, %v597_v63  ;;  %v1615_v5 = vpop.f32.mrb[12].mxu0 }
 0x108   : > { %v655_v6 = vadd.f32 1.0, %v1865_v2  ;;  %1882 = vpow2.f32 %v1490_v1  ;;  %v600_v7 = vsub.f32 %v2093_v21, %v1615_v5  ;;  %v561_v8 = vpop.f32.mrb[13].mxu0  ;;  %vm706_vm2 = vcmp.eq.s32.totalorder %v2117_v61, %v1495_v62  ;;  %v786_v62 = vld [vmem:[%s2380_s5 + $0x60] sm:$0xff] (!%p1498_p6) }
 0x109   : > { %1884 = vrcp.f32 %v656_v3  ;;  %v599_v9 = vsub.f32 %v2093_v21, %v561_v8  ;;  %vm1496_vm3 = vmpackc.low %vm706_vm2, %vm706_vm2  ;;  %v1965_v2 = vmov 1.0|1.0   ;;  %v709_v3 = vld [vmem:[#allocation2] sm:$0x3] }
 0x10a   : > { %v1867_v10 = vpop.eup %1866  ;;  %1886 = vrcp.f32 %v655_v6  ;;  %v1492_v11 = vmul.f32 -1.442695, %v600_v7 }
 0x10b   : > { %v1869_v12 = vpop.eup %1868  ;;  %v658_v13 = vadd.f32 1.0, %v1867_v10  ;;  %1888 = vpow2.f32 %v1489_v4  ;;  %v1491_v14 = vmul.f32 -1.442695, %v599_v9  ;;  %v1618_v15 = vpop.f32.mrb[14].mxu0  ;;  %v809_v10 = vld [vmem:[%s2380_s5 + $0x118] sm:$0xff] (!%p1498_p6) }
 0x10c   : > { %v1871_v16 = vpop.eup %1870  ;;  %1890 = vpow2.f32 %v1492_v11  ;;  %v602_v17 = vsub.f32 %v2093_v21, %v1618_v15  ;;  %v571_v18 = vpop.f32.mrb[15].mxu0  ;;  %v1968_v15 = vmov (!%p1498_p6), 0.0  }
 0x10d   : > { %v1873_v19 = vpop.eup %1872  ;;  %1892 = vrcp.f32 %v658_v13  ;;  %v601_v22 = vsub.f32 %v2093_v21, %v571_v18  ;;  %v710_v23 = vpack.c.bf16 %v1869_v12, %v1871_v16  ;;  %v1966_v12 = vmov (!%p1498_p6), 0.0|0.0   ;;  %1643 = vmatprep.mubr.msk.f32.mxu0 (!%p1498_p6), %vm1967_vm5, %v1968_v15  ;;  %v791_v16 = vld [vmem:[%s2380_s5 + $0x88] sm:$0xff] (!%p1498_p6)  ;;  %v793_v18 = vld [vmem:[%s2380_s5 + $0x98] sm:$0xff] (!%p1498_p6) }
 0x10e   : > { %v1875_v24 = vpop.eup %1874  ;;  %v657_v25 = vadd.f32 1.0, %v1873_v19  ;;  %1894 = vpow2.f32 %v1491_v14  ;;  %v1494_v26 = vmul.f32 -1.442695, %v602_v17  ;;  %1760 = vmatprep.subr.bf16.mxu0 (!%p1498_p6), %v1966_v12  ;;  %v790_v14 = vld [vmem:[%s2380_s5 + $0x80] sm:$0xff] (!%p1498_p6)  ;;  %v792_v17 = vld [vmem:[%s2380_s5 + $0x90] sm:$0xff] (!%p1498_p6) }
 0x10f   : > { %v1877_v27 = vpop.eup %1876  ;;  %v660_v28 = vadd.f32 1.0, %v1875_v24  ;;  %v1493_v29 = vmul.f32 -1.442695, %v601_v22  ;;  %1620 = vmatpush3.bf16.msra.mxu1 %v710_v23  ;;  %v772_v19 = vld [vmem:[%s2379_s4] sm:$0x3] (!%p1498_p6)  ;;  %v1788_v22 = vpack.c.bf16 (!%p1498_p6), %v791_v16, %v790_v14  ;;  %v1764_v23 = vpack.c.bf16 (!%p1498_p6), %v793_v18, %v792_v17 }
 0x110   : > { %v1879_v30 = vpop.eup %1878  ;;  %1896 = vrcp.f32 %v657_v25  ;;  %1621 = vmatprep.subr.bf16.mxu1 %v1963_v20  ;;  %v794_v24 = vld [vmem:[%s2380_s5 + $0xa0] sm:$0xff] (!%p1498_p6)  ;;  %v1108_v14 = vsub.s32 (!%p1498_p6), 0, %v2117_v61 }
 0x111   : > { %v1881_v31 = vpop.eup %1880  ;;  %1898 = vrcp.f32 %v660_v28  ;;  %v711_v32 = vpack.c.bf16 %v1877_v27, %v1879_v30  ;;  %v774_v25 = vld [vmem:[%s2380_s5] sm:$0xff] (!%p1498_p6)  ;;  %v795_v27 = vld [vmem:[%s2380_s5 + $0xa8] sm:$0xff] (!%p1498_p6)  ;;  %v797_v30 = vld [vmem:[%s2380_s5 + $0xb8] sm:$0xff] (!%p1498_p6) }
 0x112   : > { %v1883_v33 = vpop.eup %1882  ;;  %v659_v34 = vadd.f32 1.0, %v1881_v31  ;;  %1900 = vpow2.f32 %v1494_v26  ;;  %v775_v26 = vld [vmem:[%s2380_s5 + $0x8] sm:$0xff] (!%p1498_p6)  ;;  %v1767_v28 = vpack.c.bf16 (!%p1498_p6), %v795_v27, %v794_v24  ;;  %v2280_v16 = vld [vmem:[%s2382_s7] sm:$0xff] (!%p1498_p6) }
 0x113   : > { %v1885_v21 = vpop.eup %1884  ;;  %v662_v35 = vadd.f32 1.0, %v1883_v33  ;;  %1902 = vpow2.f32 %v1493_v29  ;;  %1622 = vmatpush3.bf16.msra.mxu1 %v711_v32  ;;  %v796_v29 = vld [vmem:[%s2380_s5 + $0xb0] sm:$0xff] (!%p1498_p6)  ;;  %v1791_v31 = vpack.c.bf16 (!%p1498_p6), %v775_v26, %v774_v25  ;;  %v777_v33 = vld [vmem:[%s2380_s5 + $0x18] sm:$0xff] (!%p1498_p6)  ;;  %v1109_v17 = vrot.slane (!%p1498_p6), %v2280_v16, %v1108_v14  ;;  %v1315_v14 = vld [vmem:[%s2383_s8] sm:$0xff] (!%p1498_p6) }
 0x114   : > { %v1887_v36 = vpop.eup %1886  ;;  %1904 = vrcp.f32 %v659_v34  ;;  %1623 = vmatprep.subr.bf16.mxu1 %v1963_v20  ;;  %v776_v32 = vld [vmem:[%s2380_s5 + $0x10] sm:$0xff] (!%p1498_p6)  ;;  %v1770_v34 = vpack.c.bf16 (!%p1498_p6), %v797_v30, %v796_v29 }
 0x115   : > { %v1889_v37 = vpop.eup %1888  ;;  %v712_v38 = vpack.c.bf16 %v1885_v21, %v1887_v36  ;;  %1906 = vrcp.f32 %v662_v35  ;;  %v798_v21 = vld [vmem:[%s2380_s5 + $0xc0] sm:$0xff] (!%p1498_p6)  ;;  %v799_v35 = vld [vmem:[%s2380_s5 + $0xc8] sm:$0xff] (!%p1498_p6)  ;;  %v1794_v36 = vpack.c.bf16 (!%p1498_p6), %v777_v33, %v776_v32 }
 0x116   : > { %v1891_v39 = vpop.eup %1890  ;;  %v661_v40 = vadd.f32 1.0, %v1889_v37  ;;  %v778_v37 = vld [vmem:[%s2380_s5 + $0x20] sm:$0xff] (!%p1498_p6) }
 0x117   : > { %v1893_v41 = vpop.eup %1892  ;;  %v664_v42 = vadd.f32 1.0, %v1891_v39  ;;  %1624 = vmatpush3.bf16.msra.mxu1 %v712_v38  ;;  %v779_v38 = vld [vmem:[%s2380_s5 + $0x28] sm:$0xff] (!%p1498_p6)  ;;  %v1773_v39 = vpack.c.bf16 (!%p1498_p6), %v799_v35, %v798_v21 }
 0x118   : > { %v1895_v43 = vpop.eup %1894  ;;  %1908 = vrcp.f32 %v661_v40  ;;  %1625 = vmatprep.subr.bf16.mxu1 %v1963_v20  ;;  %v800_v40 = vld [vmem:[%s2380_s5 + $0xd0] sm:$0xff] (!%p1498_p6) }
 0x119   : > { %1910 = vrcp.f32 %v664_v42  ;;  %v663_v44 = vadd.f32 1.0, %v1895_v43  ;;  %v1797_v42 = vpack.c.bf16 (!%p1498_p6), %v779_v38, %v778_v37  ;;  %v780_v43 = vld [vmem:[%s2380_s5 + $0x30] sm:$0xff] (!%p1498_p6)  ;;  %v815_v37 = vld [vmem:[%s2381_s6 + $0x28] sm:$0xff] (!%p1498_p6)  ;;  %v810_v38 = vld [vmem:[%s2381_s6] sm:$0xff] (!%p1498_p6) }
 0x11a   : > { %v1897_v45 = vpop.eup %1896 }
 0x11b   : > { %v1899_v46 = vpop.eup %1898  ;;  %1912 = vrcp.f32 %v663_v44  ;;  %v713_v47 = vpack.c.bf16 %v1893_v41, %v1897_v45  ;;  %v801_v41 = vld [vmem:[%s2380_s5 + $0xd8] sm:$0xff] (!%p1498_p6) }
 0x11c   : > { %v1901_v48 = vpop.eup %1900  ;;  %v781_v44 = vld [vmem:[%s2380_s5 + $0x38] sm:$0xff] (!%p1498_p6)  ;;  %v1776_v45 = vpack.c.bf16 (!%p1498_p6), %v801_v41, %v800_v40  ;;  %v811_v40 = vld [vmem:[%s2381_s6 + $0x8] sm:$0xff] (!%p1498_p6) }
 0x11d   : > { %v1903_v49 = vpop.eup %1902  ;;  %v666_v50 = vadd.f32 1.0, %v1901_v48  ;;  %1626 = vmatpush3.bf16.msra.mxu1 %v713_v47  ;;  %v803_v47 = vld [vmem:[%s2380_s5 + $0xe8] sm:$0xff] (!%p1498_p6)  ;;  %v1800_v48 = vpack.c.bf16 (!%p1498_p6), %v781_v44, %v780_v43  ;;  %v1821_v41 = vpack.c.bf16 (!%p1498_p6), %v811_v40, %v810_v38  ;;  %v817_v43 = vld [vmem:[%s2381_s6 + $0x38] sm:$0xff] (!%p1498_p6)  ;;  %v812_v44 = vld [vmem:[%s2381_s6 + $0x10] sm:$0xff] (!%p1498_p6) }
 0x11e   : > { %v1905_v51 = vpop.eup %1904  ;;  %v665_v52 = vadd.f32 1.0, %v1903_v49  ;;  %1627 = vmatprep.subr.bf16.mxu1 %v1963_v20  ;;  %v782_v49 = vld [vmem:[%s2380_s5 + $0x40] sm:$0xff] (!%p1498_p6) }
 0x11f   : > { %1914 = vrcp.f32 %v666_v50  ;;  %v714_v53 = vpack.c.bf16 %v1899_v46, %v1905_v51  ;;  %v1907_v54 = vpop.eup %1906  ;;  %v802_v46 = vld [vmem:[%s2380_s5 + $0xe0] sm:$0xff] (!%p1498_p6)  ;;  %v783_v50 = vld [vmem:[%s2380_s5 + $0x48] sm:$0xff] (!%p1498_p6) }
 0x120   : > { %1916 = vrcp.f32 %v665_v52  ;;  %v1779_v51 = vpack.c.bf16 (!%p1498_p6), %v803_v47, %v802_v46  ;;  %v804_v52 = vld [vmem:[%s2380_s5 + $0xf0] sm:$0xff] (!%p1498_p6)  ;;  %v813_v46 = vld [vmem:[%s2381_s6 + $0x18] sm:$0xff] (!%p1498_p6) }
 0x121   : > { %1628 = vmatpush3.bf16.msra.mxu1 %v714_v53  ;;  %v805_v53 = vld [vmem:[%s2380_s5 + $0xf8] sm:$0xff] (!%p1498_p6)  ;;  %v1824_v47 = vpack.c.bf16 (!%p1498_p6), %v813_v46, %v812_v44 }
 0x122   : > { %v1909_v55 = vpop.eup %1908  ;;  %1629 = vmatprep.subr.bf16.mxu1 %v1963_v20 }
 0x123   : > { %v1911_v57 = vpop.eup %1910  ;;  %v715_v58 = vpack.c.bf16 %v1907_v54, %v1909_v55  ;;  %v1803_v54 = vpack.c.bf16 (!%p1498_p6), %v783_v50, %v782_v49  ;;  %v784_v55 = vld [vmem:[%s2380_s5 + $0x50] sm:$0xff] (!%p1498_p6) }
 0x125   : > { %v1913_v59 = vpop.eup %1912  ;;  %1630 = vmatpush3.bf16.msra.mxu1 %v715_v58  ;;  %v806_v58 = vld [vmem:[%s2380_s5 + $0x100] sm:$0xff] (!%p1498_p6) }
 0x126   : > { %1631 = vmatprep.subr.bf16.mxu1 %v1963_v20  ;;  %v716_v60 = vpack.c.bf16 %v1911_v57, %v1913_v59  ;;  %v1782_v57 = vpack.c.bf16 (!%p1498_p6), %v805_v53, %v804_v52  ;;  %v807_v59 = vld [vmem:[%s2380_s5 + $0x108] sm:$0xff] (!%p1498_p6)  ;;  %v1135_v52 = vsub.s32 (!%p1498_p6), 5, %v2117_v61 }
 0x129   : > { %v1915_v63 = vpop.eup %1914  ;;  %1632 = vmatpush3.bf16.msra.mxu1 %v716_v60  ;;  %v1806_v60 = vpack.c.bf16 (!%p1498_p6), %v785_v56, %v784_v55  ;;  %v1136_v56 = vrot.slane (!%p1498_p6), %v2280_v16, %v1135_v52 }
 0x12a   : > { %v1917_v0 = vpop.eup %1916  ;;  %1633 = vmatprep.subr.bf16.mxu1 %v1963_v20  ;;  %v808_v20 = vld [vmem:[%s2380_s5 + $0x110] sm:$0xff] (!%p1498_p6) }
 0x12b   : > { %v717_v1 = vpack.c.bf16 %v1915_v63, %v1917_v0  ;;  %v1761_v13 = vpack.c.bf16 (!%p1498_p6), %v809_v10, %v808_v20  ;;  %v787_v63 = vld [vmem:[%s2380_s5 + $0x68] sm:$0xff] (!%p1498_p6)  ;;  %v1785_v0 = vpack.c.bf16 (!%p1498_p6), %v807_v59, %v806_v58  ;;  %v1218_v59 = vsub.s32 (!%p1498_p6), 2, %v2117_v61 }
 0x12d   : > { %1634 = vmatpush3.bf16.msra.mxu1 %v717_v1  ;;  %1762 = vmatpush3.bf16.msra.mxu0 (!%p1498_p6), %v1761_v13  ;;  %v1809_v1 = vpack.c.bf16 (!%p1498_p6), %v787_v63, %v786_v62  ;;  %v1219_v62 = vrot.slane (!%p1498_p6), %v2280_v16, %v1218_v59 }
 0x12e   : > { %1763 = vmatprep.subr.bf16.mxu1 (!%p1498_p6), %v1966_v12  ;;  %1787 = vmatprep.subr.bf16.mxu0 (!%p1498_p6), %v1966_v12 }
 0x130   : > { %1636 = vmatmul.mubr.msk.bf16.vlgmr.msra.gmra.mrb[0].mxu1 %vm1496_vm3, %v1965_v2  ;;  %1644 = vmatmul.mubr.msk.f32.vlgmr.msra.gmra.mrb[0].mxu0 (!%p1498_p6), %vm386_vm0, %v772_v19  ;;  %v788_v2 = vld [vmem:[%s2380_s5 + $0x70] sm:$0xff] (!%p1498_p6) }
 0x131   : > { %1678 = vmatprep.mubr.msk.f32.mxu1 (!%p1498_p6), %vm1967_vm5, %v1968_v15  ;;  %1765 = vmatpush3.bf16.msra.mxu1 (!%p1498_p6), %v1764_v23 }
 0x132   : > { %1766 = vmatprep.subr.bf16.mxu1 (!%p1498_p6), %v1966_v12  ;;  %1789 = vmatpush3.bf16.msra.mxu0 (!%p1498_p6), %v1788_v22 }
 0x133   : > { %1685 = vmatprep.mubr.msk.f32.mxu0 (!%p1498_p6), %vm1967_vm5, %v1968_v15  ;;  %1790 = vmatprep.subr.bf16.mxu0 (!%p1498_p6), %v1966_v12 }
 0x135   : > { %1768 = vmatpush3.bf16.msra.mxu1 (!%p1498_p6), %v1767_v28  ;;  %1686 = vmatmul.mubr.msk.f32.vlgmr.msra.gmra.mrb[2].mxu0 (!%p1498_p6), %vm386_vm0, %v772_v19 }
 0x136   : > { %1769 = vmatprep.subr.bf16.mxu1 (!%p1498_p6), %v1966_v12  ;;  %1792 = vmatpush3.bf16.msra.mxu0 (!%p1498_p6), %v1791_v31 }
 0x137   : > { %1720 = vmatprep.mubr.msk.f32.mxu0 (!%p1498_p6), %vm1967_vm5, %v1968_v15  ;;  %1793 = vmatprep.subr.bf16.mxu0 (!%p1498_p6), %v1966_v12 }
 0x139   : > { %1771 = vmatpush3.bf16.msra.mxu1 (!%p1498_p6), %v1770_v34 }
 0x13a   : > { %1772 = vmatprep.subr.bf16.mxu1 (!%p1498_p6), %v1966_v12  ;;  %1795 = vmatpush3.bf16.msra.mxu0 (!%p1498_p6), %v1794_v36  ;;  %v814_v36 = vld [vmem:[%s2381_s6 + $0x20] sm:$0xff] (!%p1498_p6) }
 0x13b   : > { %1796 = vmatprep.subr.bf16.mxu0 (!%p1498_p6), %v1966_v12 }
 0x13d   : > { %1774 = vmatpush3.bf16.msra.mxu1 (!%p1498_p6), %v1773_v39  ;;  %v1815_v39 = vpack.c.bf16 (!%p1498_p6), %v815_v37, %v814_v36 }
 0x13e   : > { %1775 = vmatprep.subr.bf16.mxu1 (!%p1498_p6), %v1966_v12  ;;  %1798 = vmatpush3.bf16.msra.mxu0 (!%p1498_p6), %v1797_v42  ;;  %v816_v42 = vld [vmem:[%s2381_s6 + $0x30] sm:$0xff] (!%p1498_p6) }
 0x13f   : > { %1799 = vmatprep.subr.bf16.mxu0 (!%p1498_p6), %v1966_v12 }
 0x141   : > { %1777 = vmatpush3.bf16.msra.mxu1 (!%p1498_p6), %v1776_v45  ;;  %v1818_v45 = vpack.c.bf16 (!%p1498_p6), %v817_v43, %v816_v42 }
 0x142   : > { %1778 = vmatprep.subr.bf16.mxu1 (!%p1498_p6), %v1966_v12  ;;  %1801 = vmatpush3.bf16.msra.mxu0 (!%p1498_p6), %v1800_v48 }
 0x143   : > { %1802 = vmatprep.subr.bf16.mxu0 (!%p1498_p6), %v1966_v12 }
 0x145   : > { %1780 = vmatpush3.bf16.msra.mxu1 (!%p1498_p6), %v1779_v51  ;;  %v1130_v51 = vsub.s32 (!%p1498_p6), 4, %v2117_v61 }
 0x146   : > { %1781 = vmatprep.subr.bf16.mxu1 (!%p1498_p6), %v1966_v12  ;;  %1804 = vmatpush3.bf16.msra.mxu0 (!%p1498_p6), %v1803_v54 }
 0x147   : > { %1805 = vmatprep.subr.bf16.mxu0 (!%p1498_p6), %v1966_v12  ;;  %v1131_v53 = vrot.slane (!%p1498_p6), %v2280_v16, %v1130_v51 }
 0x149   : > { %1783 = vmatpush3.bf16.msra.mxu1 (!%p1498_p6), %v1782_v57 }
 0x14a   : > { %1784 = vmatprep.subr.bf16.mxu1 (!%p1498_p6), %v1966_v12  ;;  %1807 = vmatpush3.bf16.msra.mxu0 (!%p1498_p6), %v1806_v60  ;;  %v1140_v60 = vsub.s32 (!%p1498_p6), 3, %v2117_v61 }
 0x14b   : > { %1808 = vmatprep.subr.bf16.mxu0 (!%p1498_p6), %v1966_v12 }
 0x14c   : > { %v1141_v63 = vrot.slane (!%p1498_p6), %v2280_v16, %v1140_v60 }
 0x14d   : > { %1786 = vmatpush3.bf16.msra.mxu1 (!%p1498_p6), %v1785_v0 }
 0x14e   : > { %1814 = vmatprep.subr.bf16.mxu1 (!%p1498_p6), %v1966_v12  ;;  %1810 = vmatpush3.bf16.msra.mxu0 (!%p1498_p6), %v1809_v1 }
 0x14f   : > { %1811 = vmatprep.subr.bf16.mxu0 (!%p1498_p6), %v1966_v12 }
 0x200   : > { %763 = sbr.rel (%p1498_p6) target bundleno = 1963 (0x7ab), region = 68 }
 0x203   : > { %v752_v4 = vpop.f32.mrb[0].mxu1  ;;  %v887_v20 = vpop.f32.mrb[0].mxu0 (!%p1498_p6) }
 0x204   : > { %v758_v5 = vadd.f32 %v752_v4, %v709_v3  ;;  %v1637_v6 = vpop.f32.mrb[1].mxu1  ;;  %v789_v3 = vld [vmem:[%s2380_s5 + $0x78] sm:$0xff] (!%p1498_p6)  ;;  %v1645_v10 = vpop.f32.mrb[1].mxu0 (!%p1498_p6) }
 0x205   : > { %v755_v7 = vpop.f32.mrb[2].mxu1  ;;  %v1812_v4 = vpack.c.bf16 (!%p1498_p6), %v789_v3, %v788_v2 }
 0x206   : > { %759 = vst [vmem:[#allocation2] sm:$0x3] %v758_v5  ;;  %v1638_v8 = vpop.f32.mrb[3].mxu1 }
 0x207   : > { %1813 = vmatpush3.bf16.msra.mxu0 %v1812_v4 }
 0x208   : > { %1820 = vmatprep.subr.bf16.mxu0 %v1966_v12 }
 0x20d   : > { %v2127_v9 = vld [vmem:[#allocation2] sm:$0x3] }
 0x20e   : > { %v766_v11 = vsel %vm765_vm4, %v2127_v9, -inf }
 0x20f   : > { %767 = vmax.xlane.f32.xlu0 %v766_v11  ;;  %v1032_v11 = vpop.f32.mrb[2].mxu0 }
 0x210   : > { %v1687_v13 = vpop.f32.mrb[3].mxu0 }
 0x29c   : > { %v768_v5 = vpop.xlane.xlu0 %767 }
 0x29d   : > { %v769_v6 = vmax.f32 %v768_v5, 1e-06 }
 0x29f   : > { %1918 = vrcp.f32 %v769_v6 }
 0x2a9   : > { %v1919_v7 = vpop.eup %1918 }
 0x2aa   : > { %v771_v8 = vmul.f32 %v1919_v7, %v2127_v9  ;;  %v963_v9 = vsub.s32 1, %v2117_v61 }
 0x2ac   : > { %1679 = vmatmul.mubr.f32.vlgmr.msra.gmra.mrb[0].mxu1 %v771_v8  ;;  %1721 = vmatmul.mubr.f32.vlgmr.msra.gmra.mrb[4].mxu0 %v771_v8  ;;  %v964_v23 = vrot.slane %v2280_v16, %v963_v9  ;;  %v1316_v9 = vld [vmem:[%s2383_s8 + $0x8] sm:$0xff] }
 0x2ad   : > { %1731 = vmatprep.mubr.msk.f32.mxu1 %vm1967_vm5, %v1968_v15  ;;  %1742 = vmatprep.mubr.msk.f32.mxu0 %vm1967_vm5, %v1968_v15 }
 0x2ae   : > { %1816 = vmatpush3.bf16.msra.mxu1 %v1815_v39  ;;  %1822 = vmatpush3.bf16.msra.mxu0 %v1821_v41 }
 0x2af   : > { %1817 = vmatprep.subr.bf16.mxu1 %v1966_v12  ;;  %1823 = vmatprep.subr.bf16.mxu0 %v1966_v12 }
 0x2b2   : > { %1819 = vmatpush3.bf16.msra.mxu1 %v1818_v45  ;;  %1825 = vmatpush3.bf16.msra.mxu0 %v1824_v47 }
 0x2b3   : > { %1826 = vmatprep.subr.bf16.mxu1 %v1966_v12 }
 0x37f   : > { %v957_v18 = vpop.f32.mrb[0].mxu1  ;;  %v1102_v19 = vpop.f32.mrb[4].mxu0 }
 0x380   : > { %v958_v22 = vadd.f32 %v957_v18, %v887_v20  ;;  %v1103_v24 = vadd.f32 %v1102_v19, %v1032_v11  ;;  %v1680_v25 = vpop.f32.mrb[1].mxu1  ;;  %v1722_v26 = vpop.f32.mrb[5].mxu0  ;;  %v1317_v18 = vld [vmem:[%s2383_s8 + $0x10] sm:$0xff]  ;;  %v1318_v19 = vld [vmem:[%s2383_s8 + $0x18] sm:$0xff] }
 0x381   : > { %v1307_v26 = vsub.s32 6, %v2117_v61 }
 0x382   : > { %v1110_v27 = vadd.f32 %v1109_v17, %v1103_v24  ;;  %v965_v28 = vadd.f32 %v964_v23, %v958_v22  ;;  %v1827_v17 = vpack.c.bf16 %v1316_v9, %v1315_v14  ;;  %v1830_v22 = vpack.c.bf16 %v1318_v19, %v1317_v18 }
 0x384   : > { %v1111_v29 = vmax.f32 %v1110_v27, 0.0  ;;  %v1312_v27 = vsub.s32 7, %v2117_v61 }
 0x386   : > { %v1112_v30 = vadd.f32 %v1111_v29, %v965_v28 }
 0x388   : > { %v1114_v31 = vsel %vm1113_vm6, %v1112_v30, 0.0 }
 0x389   : > { %1115 = vadd.xlane.f32.xlu0 %v1114_v31 }
 0x416   : > { %v1116_v32 = vpop.xlane.xlu0 %1115 }
 0x417   : > { %v1118_v33 = vmul.f32 0.03125, %v1116_v32 }
 0x419   : > { %v1119_v34 = vsub.f32 %v1112_v30, %v1118_v33  ;;  %v1313_v30 = vrot.slane %v2280_v16, %v1312_v27  ;;  %v1503_v33 = vld [vmem:[%s2384_s9] ss:$0 sm:$0xff] }
 0x41b   : > { %v1120_v21 = vmul.f32 %v1119_v34, %v1119_v34 }
 0x41d   : > { %v1121_v35 = vsel %vm1113_vm6, %v1120_v21, 0.0 }
 0x41e   : > { %1122 = vadd.xlane.f32.xlu1 %v1121_v35 }
 0x4ab   : > { %v1123_v48 = vpop.xlane.xlu1 %1122 }
 0x4ac   : > { %v1124_v49 = vmul.f32 0.03125, %v1123_v48 }
 0x4ae   : > { %v1125_v50 = vadd.f32 1e-05, %v1124_v49 }
 0x4b0   : > { %1920 = vrsqrt.f32 %v1125_v50 }
 0x4ba   : > { %v1921_v54 = vpop.eup %1920 }
 0x4bb   : > { %v1127_v55 = vmul.f32 %v1921_v54, %v1119_v34 }
 0x4bd   : > { %v1132_v57 = vmul.f32 %v1131_v53, %v1127_v55 }
 0x4bf   : > { %v1137_v58 = vadd.f32 %v1136_v56, %v1132_v57 }
 0x4c1   : > { %1732 = vmatmul.mubr.msk.f32.vlgmr.msra.gmra.mrb[2].mxu1 %vm1142_vm7, %v1137_v58  ;;  %1743 = vmatmul.mubr.msk.f32.vlgmr.msra.gmra.mrb[6].mxu0 %vm1142_vm7, %v1137_v58 }
 0x4c2   : > { %1753 = vmatprep.mubr.msk.f32.mxu1 %vm1967_vm5, %v1968_v15  ;;  %1828 = vmatpush3.bf16.msra.mxu1 %v1827_v17 }
 0x4c3   : > { %1829 = vmatprep.subr.bf16.mxu1 %v1966_v12  ;;  %v1308_v12 = vrot.slane %v2280_v16, %v1307_v26 }
 0x4c6   : > { %1831 = vmatpush3.bf16.msra.mxu1 %v1830_v22 }
 0x594   : > { %v1212_v0 = vpop.f32.mrb[2].mxu1  ;;  %v1286_v1 = vpop.f32.mrb[6].mxu0 }
 0x595   : > { %v1287_v2 = vadd.f32 %v1286_v1, %v1219_v62  ;;  %v1733_v3 = vpop.f32.mrb[3].mxu1  ;;  %v1744_v4 = vpop.f32.mrb[7].mxu0  ;;  %v1213_v5 = vadd.f32 %v1212_v0, %v1141_v63 }
 0x597   : > { %v1290_v6 = vmax.f32 %v1287_v2, 0.0 }
 0x599   : > { %v1291_v7 = vadd.f32 %v1290_v6, %v1213_v5 }
 0x59b   : > { %v1292_v8 = vsel %vm1113_vm6, %v1291_v7, 0.0 }
 0x59c   : > { %1293 = vadd.xlane.f32.xlu1 %v1292_v8 }
 0x629   : > { %v1294_v15 = vpop.xlane.xlu1 %1293 }
 0x62a   : > { %v1295_v20 = vmul.f32 0.03125, %v1294_v15 }
 0x62c   : > { %v1296_v10 = vsub.f32 %v1291_v7, %v1295_v20 }
 0x62e   : > { %v1297_v11 = vmul.f32 %v1296_v10, %v1296_v10 }
 0x630   : > { %v1298_v13 = vsel %vm1113_vm6, %v1297_v11, 0.0 }
 0x631   : > { %1299 = vadd.xlane.f32.xlu0 %v1298_v13 }
 0x6be   : > { %v1300_v23 = vpop.xlane.xlu0 %1299 }
 0x6bf   : > { %v1301_v24 = vmul.f32 0.03125, %v1300_v23 }
 0x6c1   : > { %v1302_v25 = vadd.f32 1e-05, %v1301_v24 }
 0x6c3   : > { %1922 = vrsqrt.f32 %v1302_v25 }
 0x6cd   : > { %v1923_v28 = vpop.eup %1922 }
 0x6ce   : > { %v1304_v29 = vmul.f32 %v1923_v28, %v1296_v10 }
 0x6d0   : > { %v1309_v31 = vmul.f32 %v1308_v12, %v1304_v29 }
 0x6d2   : > { %v1314_v32 = vadd.f32 %v1313_v30, %v1309_v31 }
 0x6d4   : > { %1754 = vmatmul.mubr.msk.f32.vlgmr.msra.gmra.mrb[4].mxu1 %vm1142_vm7, %v1314_v32 }
 0x7a7   : > { %v1395_v34 = vpop.f32.mrb[4].mxu1 }
 0x7a8   : > { %v1396_v21 = vadd.f32 %v1503_v33, %v1395_v34  ;;  %v1755_v35 = vpop.f32.mrb[5].mxu1 }
 0x7aa   : > { %1399 = vst [vmem:[#allocation3] sm:$0x3] %v1396_v21 }
 0x7ab PF: > { %p1836_p7 = scmp.eq.s32.totalorder %s2031_s14, 1  ;;  %s1969_s26 = smov [#allocation3]  }
 0x7ac   : > { %s1407_s27 = sshll.u32 %s1969_s26, 4  ;;  %s1408_s27 = int_to_ptr.vmem [resolvable:$true] %s1407_s27 }
 0x7ad   : > { %s1924_s28 = scalar_lea.vmem %s1408_s27, 32  ;;  %p1931_p11 = scmp.lt.s32.totalorder %s1408_s27, %s1408_s27 }
 0x7ae   : > { %p1925_p8 = scmp.ne.s32.totalorder %s1408_s27, %s1924_s28  ;;  %p1932_p12 = scmp.lt.s32.totalorder %s1924_s28, %s1924_s28 }
 0x7b0   : > { %p1926_p9 = pnand %p1925_p8, %p1836_p7  ;;  %p1933_p13 = por %p1932_p12, %p1931_p11 }
 0x7b2   : > { %p1927_p10 = pneg %p1926_p9 }
 0x7b4   : > { %p1934_p0 = pnand %p1933_p13, %p1927_p10 }
 0x7b6   : > { %1937 = shalt.err (!%p1934_p0)
}
 0x7b7   : > { %s1938_s11 = scalar_lea.hbm %s2385_s10, 32 }
 0x7b8   : > { %p1939_p1 = scmp.ne.s32.totalorder %s2385_s10, %s1938_s11  ;;  %p1944_p4 = scmp.lt.u32.totalorder %s1938_s11, %s2385_s10 }
 0x7ba   : > { %p1940_p2 = pnand %p1939_p1, %p1836_p7 }
 0x7bc   : > { %p1941_p3 = pneg %p1940_p2 }
 0x7be   : > { %p1946_p5 = pnand %p1944_p4, %p1941_p3 }
 0x7c0   : > { %1949 = shalt.err (!%p1946_p5)
}
 0x7c1   : > { %1833 = dma.vmem_to_hbm [thread:$0]  (%p1836_p7), %s1408_s27, 32, %s2385_s10, [#allocation4]  }
 0x7c2   : > { %1955 = dma.done.wait (%p1836_p7), [#allocation4], 32  }
 0x7c3   : > { %1957 = vsyncadd (%p1836_p7), [#allocation4], 4294967264 }
 0x7c4 PF: > { %s21_s13 = sadd.s32 1, %s1960_s13  }
 0x7c5   : > { %p18_p6 = scmp.ge.s32.totalorder %s21_s13, 4  }
 0x7c7   :  { %20 = sbr.rel (!%p18_p6) target bundleno = 1 (0x1), region = 98 }
 0x7ce   :  { %1420 = vsyncpa [#allocation4], 1 }
 0x7cf   :  { %1422 = vsyncpa [#allocation4 + $0x1], 1 }

</bundles_post_ra>
